<compile_context>
chip_gen: v7x
topology: tpu7x:2x2x1
jax: 0.10.0
libtpu: 0.0.40
codegen_flags: <defaults>
</compile_context>

<pallas_src>
import jax
import jax.numpy as jnp
from jax.experimental import pallas as pl
from jax.experimental.pallas import tpu as pltpu


def _attention_kernel(x1_ref, x2_ref, w1_ref, w2_ref, b_ref, o_ref):
    """One batch tile of the fused concat -> Linear(2H,1) -> tanh -> softmax.

    x1_ref, x2_ref : [S, Bt, H]  VMEM, native dtype (prev_hidden / encoder_outputs)
    w1_ref, w2_ref : [1, 1, H]   VMEM, split Linear weight (resident across grid)
    b_ref          : [1]         SMEM, Linear bias (scalar)
    o_ref          : [Bt, S]     VMEM, softmax over S
    """
    # Load in native dtype (bf16 inputs keep their HBM-read savings), compute in
    # f32 inside the kernel (required on v5e, cheap everywhere).
    x1 = x1_ref[...].astype(jnp.float32)
    x2 = x2_ref[...].astype(jnp.float32)
    w1 = w1_ref[...].astype(jnp.float32)
    w2 = w2_ref[...].astype(jnp.float32)

    # Linear(2H -> 1) fused over the two halves of the (virtual) concat:
    #   energy[s, b] = sum_h x1[s,b,h]*w1[h] + sum_h x2[s,b,h]*w2[h] + bias
    energy = jnp.sum(x1 * w1, axis=-1) + jnp.sum(x2 * w2, axis=-1) + b_ref[0]  # [S, Bt]
    energy = jnp.tanh(energy)

    # Transpose the small [S, Bt] result so S lands on the lane axis: the softmax
    # reduce and the [Bt, S] output store are then lane-dense.
    logits = energy.T                                   # [Bt, S]
    m = jnp.max(logits, axis=-1, keepdims=True)
    p = jnp.exp(logits - m)
    denom = jnp.sum(p, axis=-1, keepdims=True)
    attn = p * pl.reciprocal(denom, approx=True)        # EUP reciprocal, free slot
    o_ref[...] = attn.astype(o_ref.dtype)


def _pick_batch_tile(B, S, H, itemsize, vmem_budget_bytes=4 * 1024 * 1024):
    """Largest legal batch tile: multiple of 8 (or == B), divides B, and keeps the
    pipelined input working set (2 inputs x 2 buffers x tile) within budget."""
    if B <= 8 or B % 8 != 0:
        return B                        # block dim == full array dim is always legal
    per_row = 4 * S * H * itemsize      # 2 inputs x 2 pipeline buffers, one batch row
    bt = (vmem_budget_bytes // max(per_row, 1)) // 8 * 8
    bt = int(min(max(bt, 8), B))
    while B % bt != 0:
        bt -= 8
    return max(bt, 8)


def attention_forward(prev_hidden, encoder_outputs, weight, bias, *, batch_tile=None):
    """prev_hidden, encoder_outputs: [S, B, H]; weight: [1, 2H]; bias: [1].
    Returns attention of shape [B, S] (matches the torch code, not its docstring)."""
    S, B, H = prev_hidden.shape
    assert encoder_outputs.shape == (S, B, H)
    assert weight.shape == (1, 2 * H)

    # Only tiny parameter glue here -- the big activations pass through untouched
    # (no concat / transpose / f32 upcast in HBM).
    w1 = weight[:, :H].reshape(1, 1, H)
    w2 = weight[:, H:].reshape(1, 1, H)
    b = bias.reshape(1).astype(jnp.float32)

    if batch_tile is None:
        batch_tile = _pick_batch_tile(B, S, H, jnp.dtype(prev_hidden.dtype).itemsize)
    Bt = batch_tile
    assert B % Bt == 0, (B, Bt)

    return pl.pallas_call(
        _attention_kernel,
        out_shape=jax.ShapeDtypeStruct((B, S), prev_hidden.dtype),
        grid=(B // Bt,),
        in_specs=[
            pl.BlockSpec((S, Bt, H), lambda i: (0, i, 0)),      # prev_hidden tile
            pl.BlockSpec((S, Bt, H), lambda i: (0, i, 0)),      # encoder_outputs tile
            pl.BlockSpec((1, 1, H), lambda i: (0, 0, 0)),       # w1: resident, DMA'd once
            pl.BlockSpec((1, 1, H), lambda i: (0, 0, 0)),       # w2: resident, DMA'd once
            pl.BlockSpec(memory_space=pltpu.MemorySpace.SMEM),  # bias scalar
        ],
        out_specs=pl.BlockSpec((Bt, S), lambda i: (i, 0)),
        compiler_params=pltpu.CompilerParams(
            dimension_semantics=("parallel",),   # batch tiles shard over v7x's 2 TCs
            vmem_limit_bytes=32 * 1024 * 1024,   # explicit, safe on v5e/v6e/v7x
        ),
    )(prev_hidden, encoder_outputs, w1, w2, b)


def _reference(prev_hidden, encoder_outputs, weight, bias):
    # Pure-JAX reference mirroring the torch module.
    x = jnp.concatenate([prev_hidden, encoder_outputs], axis=2).astype(jnp.float32)
    energy = jnp.tanh(x @ weight.T + bias)              # [S, B, 1]
    logits = jnp.squeeze(energy, axis=2).T              # [B, S]
    return jax.nn.softmax(logits, axis=1)


if __name__ == "__main__":
    seq_len, batch, hidden = 8, 2, 32

    key = jax.random.PRNGKey(0)
    k1, k2, k3, k4 = jax.random.split(key, 4)

    # Inputs (torch layout [seq_len, batch, hidden]).
    prev_hidden = jax.random.normal(k1, (seq_len, batch, hidden), dtype=jnp.float32)
    encoder_outputs = jax.random.normal(k2, (seq_len, batch, hidden), dtype=jnp.float32)

    # Parameters of nn.Linear(hidden*2, 1), initialized ~ N(0, 1) as in the module.
    weight = jax.random.normal(k3, (1, 2 * hidden), dtype=jnp.float32)
    bias = jax.random.normal(k4, (1,), dtype=jnp.float32)

    out = jax.block_until_ready(attention_forward(prev_hidden, encoder_outputs, weight, bias))
    ref = _reference(prev_hidden, encoder_outputs, weight, bias)
    assert out.shape == (batch, seq_len), out.shape
    # Tolerance loosened slightly because the softmax uses pl.reciprocal(approx=True).
    assert jnp.allclose(out, ref, atol=1e-2, rtol=1e-2), "mismatch vs reference (f32)"

    # Multi-tile grid path: batch tiled at 8 -> 2 pipelined grid steps.
    B2 = 16
    kb1, kb2 = jax.random.split(jax.random.PRNGKey(1))
    ph2 = jax.random.normal(kb1, (seq_len, B2, hidden), dtype=jnp.float32)
    eo2 = jax.random.normal(kb2, (seq_len, B2, hidden), dtype=jnp.float32)
    out2 = jax.block_until_ready(attention_forward(ph2, eo2, weight, bias, batch_tile=8))
    ref2 = _reference(ph2, eo2, weight, bias)
    assert out2.shape == (B2, seq_len), out2.shape
    assert jnp.allclose(out2, ref2, atol=1e-2, rtol=1e-2), "mismatch vs reference (tiled)"

    # Native-bf16 smoke test: inputs stream into the kernel as bf16 (half the HBM
    # read bytes); math is done in f32 inside the kernel.
    ph_bf = prev_hidden.astype(jnp.bfloat16)
    eo_bf = encoder_outputs.astype(jnp.bfloat16)
    out_bf = jax.block_until_ready(attention_forward(ph_bf, eo_bf, weight, bias))
    out_bf_f32 = out_bf.astype(jnp.float32)
    assert out_bf.shape == (batch, seq_len), out_bf.shape
    assert jnp.all(jnp.isfinite(out_bf_f32))
    assert jnp.allclose(jnp.sum(out_bf_f32, axis=1), 1.0, atol=5e-2), "bf16 rows ~ 1"

    print("KERNEL_OK")
</pallas_src>

<mosaic_0001>
module attributes {stable_mosaic.version = 11 : i64} {
  func.func @_attention_kernel(%arg0: i32, %arg1: memref<8x2x32xf32, #tpu.memory_space<vmem>>, %arg2: memref<8x2x32xf32, #tpu.memory_space<vmem>>, %arg3: memref<1x1x32xf32, #tpu.memory_space<vmem>>, %arg4: memref<1x1x32xf32, #tpu.memory_space<vmem>>, %arg5: memref<1xf32, #tpu.memory_space<smem>>, %arg6: memref<2x8xf32, #tpu.memory_space<vmem>>) attributes {dimension_semantics = [#tpu.dimension_semantics<parallel>], iteration_bounds = array<i64: 1>, scalar_prefetch = 0 : i64, scratch_operands = 0 : i64, tpu.core_type = #tpu.core_type<tc>, window_params = [{transform_indices = @transform_0, window_bounds = array<i64: 8, 2, 32>}, {transform_indices = @transform_1, window_bounds = array<i64: 8, 2, 32>}, {pipeline_mode = #tpu.pipeline_mode<synchronous>, transform_indices = @transform_2, window_bounds = array<i64: 1, 1, 32>}, {pipeline_mode = #tpu.pipeline_mode<synchronous>, transform_indices = @transform_3, window_bounds = array<i64: 1, 1, 32>}, {transform_indices = @transform_4, window_bounds = array<i64: 1>}, {transform_indices = @transform_5, window_bounds = array<i64: 2, 8>}]} {
    %c0 = arith.constant 0 : index
    %c0_0 = arith.constant 0 : index
    %c0_1 = arith.constant 0 : index
    %0 = vector.load %arg1[%c0, %c0_0, %c0_1] : memref<8x2x32xf32, #tpu.memory_space<vmem>>, vector<8x2x32xf32>
    %c0_2 = arith.constant 0 : index
    %c0_3 = arith.constant 0 : index
    %c0_4 = arith.constant 0 : index
    %1 = vector.load %arg2[%c0_2, %c0_3, %c0_4] : memref<8x2x32xf32, #tpu.memory_space<vmem>>, vector<8x2x32xf32>
    %c0_5 = arith.constant 0 : index
    %c0_6 = arith.constant 0 : index
    %c0_7 = arith.constant 0 : index
    %2 = vector.load %arg3[%c0_5, %c0_6, %c0_7] : memref<1x1x32xf32, #tpu.memory_space<vmem>>, vector<1x1x32xf32>
    %c0_8 = arith.constant 0 : index
    %c0_9 = arith.constant 0 : index
    %c0_10 = arith.constant 0 : index
    %3 = vector.load %arg4[%c0_8, %c0_9, %c0_10] : memref<1x1x32xf32, #tpu.memory_space<vmem>>, vector<1x1x32xf32>
    %4 = vector.broadcast %2 : vector<1x1x32xf32> to vector<8x2x32xf32>
    %5 = arith.mulf %0, %4 : vector<8x2x32xf32>
    %cst = arith.constant dense<0.000000e+00> : vector<8x2xf32>
    %6 = vector.multi_reduction <add>, %5, %cst [2] : vector<8x2x32xf32> to vector<8x2xf32>
    %7 = vector.broadcast %3 : vector<1x1x32xf32> to vector<8x2x32xf32>
    %8 = arith.mulf %1, %7 : vector<8x2x32xf32>
    %cst_11 = arith.constant dense<0.000000e+00> : vector<8x2xf32>
    %9 = vector.multi_reduction <add>, %8, %cst_11 [2] : vector<8x2x32xf32> to vector<8x2xf32>
    %10 = arith.addf %6, %9 : vector<8x2xf32>
    %c0_12 = arith.constant 0 : index
    %11 = memref.load %arg5[%c0_12] : memref<1xf32, #tpu.memory_space<smem>>
    %12 = vector.broadcast %11 : f32 to vector<8x2xf32>
    %13 = arith.addf %10, %12 : vector<8x2xf32>
    %14 = math.tanh %13 : vector<8x2xf32>
    %15 = tpu.transpose %14, [1, 0] : vector<8x2xf32> -> vector<2x8xf32>
    %cst_13 = arith.constant dense<0xFF800000> : vector<2xf32>
    %16 = vector.multi_reduction <maximumf>, %15, %cst_13 [1] : vector<2x8xf32> to vector<2xf32>
    %17 = vector.shape_cast %16 : vector<2xf32> to vector<2x1xf32>
    %18 = vector.broadcast %17 : vector<2x1xf32> to vector<2x8xf32>
    %19 = arith.subf %15, %18 : vector<2x8xf32>
    %20 = math.exp %19 : vector<2x8xf32>
    %cst_14 = arith.constant dense<0.000000e+00> : vector<2xf32>
    %21 = vector.multi_reduction <add>, %20, %cst_14 [1] : vector<2x8xf32> to vector<2xf32>
    %22 = vector.shape_cast %21 : vector<2xf32> to vector<2x1xf32>
    %23 = tpu.reciprocal %22 {approx = true} : vector<2x1xf32> -> vector<2x1xf32>
    %24 = vector.broadcast %23 : vector<2x1xf32> to vector<2x8xf32>
    %25 = arith.mulf %20, %24 : vector<2x8xf32>
    %c0_15 = arith.constant 0 : index
    %c0_16 = arith.constant 0 : index
    %26 = vector.load %arg6[%c0_15, %c0_16] : memref<2x8xf32, #tpu.memory_space<vmem>>, vector<2x8xf32>
    tpu.vector_store %arg6[%c0_15, %c0_16], %25 {strides = array<i32>} : memref<2x8xf32, #tpu.memory_space<vmem>>, vector<2x8xf32>,
    return
  }
  func.func @transform_0(%arg0: i32) -> (i32, i32, i32) {
    %c0_i32 = arith.constant 0 : i32
    %c0_i32_0 = arith.constant 0 : i32
    %c0_i32_1 = arith.constant 0 : i32
    return %c0_i32, %arg0, %c0_i32_0 : i32, i32, i32
  }
  func.func @transform_1(%arg0: i32) -> (i32, i32, i32) {
    %c0_i32 = arith.constant 0 : i32
    %c0_i32_0 = arith.constant 0 : i32
    %c0_i32_1 = arith.constant 0 : i32
    return %c0_i32, %arg0, %c0_i32_0 : i32, i32, i32
  }
  func.func @transform_2(%arg0: i32) -> (i32, i32, i32) {
    %c0_i32 = arith.constant 0 : i32
    %c0_i32_0 = arith.constant 0 : i32
    %c0_i32_1 = arith.constant 0 : i32
    %c0_i32_2 = arith.constant 0 : i32
    return %c0_i32, %c0_i32_0, %c0_i32_1 : i32, i32, i32
  }
  func.func @transform_3(%arg0: i32) -> (i32, i32, i32) {
    %c0_i32 = arith.constant 0 : i32
    %c0_i32_0 = arith.constant 0 : i32
    %c0_i32_1 = arith.constant 0 : i32
    %c0_i32_2 = arith.constant 0 : i32
    return %c0_i32, %c0_i32_0, %c0_i32_1 : i32, i32, i32
  }
  func.func @transform_4(%arg0: i32) -> i32 {
    %c0_i32 = arith.constant 0 : i32
    %c0_i32_0 = arith.constant 0 : i32
    return %c0_i32 : i32
  }
  func.func @transform_5(%arg0: i32) -> (i32, i32) {
    %c0_i32 = arith.constant 0 : i32
    %c0_i32_0 = arith.constant 0 : i32
    return %arg0, %c0_i32 : i32, i32
  }
}

</mosaic_0001>

<bundles_post_ra>
// kernel: tpu_custom_call.1
= control target key start
LH: loop header
LB: loop body
LE: loop exit
PB: predicated region body
PF: predicated region fallthrough
CT: control target
= control target key end

     0   :  { %11 = vsyncpa [#allocation4], 0  ;;  %s488_s0 = inlined_call_operand.hbm [shape: f32[8,2,32], index: 0, kind: input, shape index: {}]   ;;  %s489_s1 = inlined_call_operand.hbm [shape: f32[8,2,32], index: 1, kind: input, shape index: {}]   ;;  %s490_s2 = inlined_call_operand.vmem [shape: f32[1,1,32], index: 2, kind: input, shape index: {}]   ;;  %s491_s3 = inlined_call_operand.vmem [shape: f32[1,1,32], index: 3, kind: input, shape index: {}]   ;;  %s492_s4 = inlined_call_operand.<no memory space> [shape: f32[1], index: 4, kind: input, shape index: {}]   ;;  %s493_s5 = inlined_call_operand.hbm [shape: f32[2,8], index: 5, kind: output, shape index: {}]  }
   0x1   :  { %12 = vsyncpa [#allocation7], 0 }
   0x2   :  { %13 = vsyncpa [#allocation5], 0  ;;  %s389_s18 = smov [#allocation3]   ;;  %s317_s22 = scalar_lea.hbm %s488_s0, 256 }
   0x3   :  { %s19_s19 = sshll.u32 %s389_s18, 4  ;;  %p318_p0 = scmp.ne.s32.totalorder %s488_s0, %s317_s22  ;;  %s20_s19 = int_to_ptr.vmem [resolvable:$true] %s19_s19 }
   0x4   :  { %p321_p1 = scmp.lt.u32.totalorder %s317_s22, %s488_s0 }
   0x6   :  { %p323_p2 = pnand %p321_p1, %p318_p0 }
   0x8   :  { %326 = shalt.err (!%p323_p2)
}
   0x9   :  { %s327_s27 = scalar_lea.vmem %s20_s19, 256  ;;  %p332_p4 = scmp.lt.s32.totalorder %s20_s19, %s20_s19 }
   0xa   :  { %p328_p3 = scmp.ne.s32.totalorder %s20_s19, %s327_s27  ;;  %p333_p5 = scmp.lt.s32.totalorder %s327_s27, %s327_s27 }
   0xc   :  { %p334_p6 = por %p333_p5, %p332_p4 }
   0xe   :  { %p335_p7 = pnand %p334_p6, %p328_p3 }
  0x10   :  { %338 = shalt.err (!%p335_p7)
}
  0x11   :  { %s390_s28 = smov 32   ;;  %s391_s29 = smov 2  }
  0x12   :  { %25 = dma.hbm_to_vmem [thread:$0]  %s488_s0, 256, %s20_s19, [#allocation4], %s390_s28, %s390_s28, %s391_s29  }
  0x13   :  { %s392_s7 = smov [#allocation6]   ;;  %s339_s11 = scalar_lea.hbm %s489_s1, 256 }
  0x14   :  { %s31_s8 = sshll.u32 %s392_s7, 4  ;;  %p340_p8 = scmp.ne.s32.totalorder %s489_s1, %s339_s11  ;;  %s32_s8 = int_to_ptr.vmem [resolvable:$true] %s31_s8 }
  0x15   :  { %p343_p9 = scmp.lt.u32.totalorder %s339_s11, %s489_s1 }
  0x17   :  { %p345_p10 = pnand %p343_p9, %p340_p8 }
  0x19   :  { %348 = shalt.err (!%p345_p10)
}
  0x1a   :  { %s349_s16 = scalar_lea.vmem %s32_s8, 256  ;;  %p354_p12 = scmp.lt.s32.totalorder %s32_s8, %s32_s8 }
  0x1b   :  { %p350_p11 = scmp.ne.s32.totalorder %s32_s8, %s349_s16  ;;  %p355_p13 = scmp.lt.s32.totalorder %s349_s16, %s349_s16 }
  0x1d   :  { %p356_p0 = por %p355_p13, %p354_p12 }
  0x1f   :  { %p357_p1 = pnand %p356_p0, %p350_p11 }
  0x21   :  { %360 = shalt.err (!%p357_p1)
}
  0x22   :  { %37 = dma.hbm_to_vmem [thread:$0]  %s489_s1, 256, %s32_s8, [#allocation7], %s390_s28, %s390_s28, %s391_s29  }
  0x23   :  { %383 = dma.done.wait [#allocation4], 256  }
  0x24   :  { %384 = vsyncadd [#allocation4], 4294967040 }
  0x25   :  { %385 = dma.done.wait [#allocation7], 256  }
  0x26   :  { %386 = vsyncadd [#allocation7], 4294967040  ;;  %vm82_vm0 = vcmask 254976   ;;  %v58_v0 = vld [vmem:[#allocation6] sm:$0x3]  ;;  %v154_v59 = vstv %s492_s4  ;;  %vm213_vm1 = vcmask 1041409  }
  0x27   :  { %v290_v1 = vld [vmem:[%s491_s3] ss:$0 sm:$0xff]  ;;  %v59_v5 = vld [vmem:[#allocation6 + $0x2] sm:$0x3]  ;;  %v51_v6 = vld [vmem:[#allocation3 + $0x2] sm:$0x3] }
  0x28   :  { %v50_v2 = vld [vmem:[#allocation3] sm:$0x3]  ;;  %v113_v3 = vmul.f32 %v290_v1, %v58_v0  ;;  %v114_v8 = vmul.f32 %v290_v1, %v59_v5  ;;  %v60_v10 = vld [vmem:[#allocation6 + $0x4] sm:$0x3]  ;;  %v52_v12 = vld [vmem:[#allocation3 + $0x4] sm:$0x3] }
  0x29   :  { %v289_v4 = vld [vmem:[%s490_s2] ss:$0 sm:$0xff]  ;;  %v115_v15 = vmul.f32 %v290_v1, %v60_v10  ;;  %v61_v18 = vld [vmem:[#allocation6 + $0x6] sm:$0x3]  ;;  %v53_v19 = vld [vmem:[#allocation3 + $0x6] sm:$0x3] }
  0x2a   :  { %v74_v7 = vmul.f32 %v289_v4, %v50_v2  ;;  %v75_v9 = vmul.f32 %v289_v4, %v51_v6  ;;  %v121_v11 = vsel %vm82_vm0, %v113_v3, 0.0  ;;  %v124_v14 = vsel %vm82_vm0, %v114_v8, 0.0  ;;  %v62_v24 = vld [vmem:[#allocation6 + $0x8] sm:$0x3]  ;;  %v54_v25 = vld [vmem:[#allocation3 + $0x8] sm:$0x3] }
  0x2b   :  { %122 = vadd.xlane.f32.xlu1 %v121_v11  ;;  %v76_v17 = vmul.f32 %v289_v4, %v52_v12  ;;  %v127_v20 = vsel %vm82_vm0, %v115_v15, 0.0  ;;  %v116_v21 = vmul.f32 %v290_v1, %v61_v18  ;;  %v77_v23 = vmul.f32 %v289_v4, %v53_v19  ;;  %v63_v30 = vld [vmem:[#allocation6 + $0xa] sm:$0x3]  ;;  %v55_v31 = vld [vmem:[#allocation3 + $0xa] sm:$0x3]  ;;  %s393_s3 = smov [#allocation8]  }
  0x2c   :  { %v83_v13 = vsel %vm82_vm0, %v74_v7, 0.0  ;;  %v86_v16 = vsel %vm82_vm0, %v75_v9, 0.0  ;;  %v117_v27 = vmul.f32 %v290_v1, %v62_v24  ;;  %v78_v29 = vmul.f32 %v289_v4, %v54_v25  ;;  %v64_v36 = vld [vmem:[#allocation6 + $0xc] sm:$0x3]  ;;  %v56_v37 = vld [vmem:[#allocation3 + $0xc] sm:$0x3] }
  0x2d   :  { %84 = vadd.xlane.f32.xlu0 %v83_v13  ;;  %v89_v22 = vsel %vm82_vm0, %v76_v17, 0.0  ;;  %v130_v26 = vsel %vm82_vm0, %v116_v21, 0.0  ;;  %v92_v28 = vsel %vm82_vm0, %v77_v23, 0.0  ;;  %v118_v33 = vmul.f32 %v290_v1, %v63_v30  ;;  %v65_v42 = vld [vmem:[#allocation6 + $0xe] sm:$0x3]  ;;  %s279_s4 = sshll.u32 %s393_s3, 4  ;;  %s280_s4 = int_to_ptr.vmem [resolvable:$true] %s279_s4 }
  0x2e   :  { %v133_v32 = vsel %vm82_vm0, %v117_v27, 0.0  ;;  %v95_v34 = vsel %vm82_vm0, %v78_v29, 0.0  ;;  %v79_v35 = vmul.f32 %v289_v4, %v55_v31  ;;  %v119_v39 = vmul.f32 %v290_v1, %v64_v36  ;;  %v57_v43 = vld [vmem:[#allocation3 + $0xe] sm:$0x3]  ;;  %s361_s22 = scalar_lea.vmem %s280_s4, 32  ;;  %p366_p3 = scmp.lt.s32.totalorder %s280_s4, %s280_s4 }
  0x2f   :  { %125 = vadd.xlane.f32.xlu1 %v124_v14  ;;  %v136_v38 = vsel %vm82_vm0, %v118_v33, 0.0  ;;  %v80_v41 = vmul.f32 %v289_v4, %v56_v37  ;;  %v120_v45 = vmul.f32 %v290_v1, %v65_v42  ;;  %v81_v47 = vmul.f32 %v289_v4, %v57_v43  ;;  %p362_p2 = scmp.ne.s32.totalorder %s280_s4, %s361_s22  ;;  %p367_p4 = scmp.lt.s32.totalorder %s361_s22, %s361_s22 }
  0x30   :  { %v98_v40 = vsel %vm82_vm0, %v79_v35, 0.0  ;;  %v139_v44 = vsel %vm82_vm0, %v119_v39, 0.0  ;;  %v179_v14 = vlaneseq  ;;  %vm215_vm2 = vcmask 1042434  }
  0x31   :  { %87 = vadd.xlane.f32.xlu0 %v86_v16  ;;  %v101_v46 = vsel %vm82_vm0, %v80_v41, 0.0  ;;  %v142_v48 = vsel %vm82_vm0, %v120_v45, 0.0  ;;  %v104_v49 = vsel %vm82_vm0, %v81_v47, 0.0  ;;  %vm217_vm3 = vcmask 1043459   ;;  %p368_p5 = por %p367_p4, %p366_p3 }
  0x32   :  { %v180_v19 = vand.u32 127, %v179_v14  ;;  %vm219_vm4 = vcmask 1044484   ;;  %vm221_vm5 = vcmask 1045509   ;;  %vm223_vm6 = vcmask 1046534  }
  0x33   :  { %128 = vadd.xlane.f32.xlu1 %v127_v20  ;;  %v182_v20 = vshrl.u32 %v179_v14, 7  ;;  %vm225_vm7 = vcmask 1047559   ;;  %vm260_vm8 = vcmask 58368   ;;  %p369_p6 = pnand %p368_p5, %p362_p2 }
  0x35   :  { %90 = vadd.xlane.f32.xlu0 %v89_v22  ;;  %v183_v25 = vsub.s32 %v180_v19, %v182_v20 }
  0x37   :  { %131 = vadd.xlane.f32.xlu1 %v130_v26 }
  0x39   :  { %93 = vadd.xlane.f32.xlu0 %v92_v28 }
  0x3b   :  { %134 = vadd.xlane.f32.xlu1 %v133_v32 }
  0x3d   :  { %96 = vadd.xlane.f32.xlu0 %v95_v34 }
  0x3f   :  { %137 = vadd.xlane.f32.xlu1 %v136_v38 }
  0x41   :  { %99 = vadd.xlane.f32.xlu0 %v98_v40 }
  0x43   :  { %140 = vadd.xlane.f32.xlu1 %v139_v44 }
  0x45   :  { %102 = vadd.xlane.f32.xlu0 %v101_v46 }
  0x47   :  { %143 = vadd.xlane.f32.xlu1 %v142_v48 }
  0x49   :  { %105 = vadd.xlane.f32.xlu0 %v104_v49 }
  0xb8   :  { %v123_v50 = vpop.xlane.xlu1 %122 }
  0xba   :  { %v85_v51 = vpop.xlane.xlu0 %84 }
  0xbb   :  { %v145_v58 = vadd.f32 %v123_v50, %v85_v51 }
  0xbc   :  { %v126_v52 = vpop.xlane.xlu1 %125 }
  0xbd   :  { %v155_v1 = vadd.f32 %v154_v59, %v145_v58 }
  0xbe   :  { %v88_v53 = vpop.xlane.xlu0 %87 }
  0xbf   :  { %v146_v60 = vadd.f32 %v126_v52, %v88_v53  ;;  %297 = vtanh.f32 %v155_v1 }
  0xc0   :  { %v129_v54 = vpop.xlane.xlu1 %128 }
  0xc1   :  { %v156_v3 = vadd.f32 %v154_v59, %v146_v60 }
  0xc2   :  { %v91_v55 = vpop.xlane.xlu0 %90 }
  0xc3   :  { %v147_v62 = vadd.f32 %v129_v54, %v91_v55  ;;  %299 = vtanh.f32 %v156_v3 }
  0xc4   :  { %v132_v56 = vpop.xlane.xlu1 %131 }
  0xc5   :  { %v157_v5 = vadd.f32 %v154_v59, %v147_v62 }
  0xc6   :  { %v94_v57 = vpop.xlane.xlu0 %93 }
  0xc7   :  { %v148_v0 = vadd.f32 %v132_v56, %v94_v57  ;;  %301 = vtanh.f32 %v157_v5 }
  0xc8   :  { %v135_v61 = vpop.xlane.xlu1 %134 }
  0xc9   :  { %v158_v7 = vadd.f32 %v154_v59, %v148_v0  ;;  %v298_v22 = vpop.eup %297 }
  0xca   :  { %v97_v63 = vpop.xlane.xlu0 %96  ;;  %v184_v31 = vrot.slane %v298_v22, %v183_v25 }
  0xcb   :  { %v149_v2 = vadd.f32 %v135_v61, %v97_v63  ;;  %303 = vtanh.f32 %v158_v7 }
  0xcc   :  { %v138_v4 = vpop.xlane.xlu1 %137 }
  0xcd   :  { %v159_v9 = vadd.f32 %v154_v59, %v149_v2  ;;  %v300_v23 = vpop.eup %299 }
  0xce   :  { %v100_v6 = vpop.xlane.xlu0 %99  ;;  %v188_v28 = vrot.slane %v300_v23, %v183_v25 }
  0xcf   :  { %v150_v8 = vadd.f32 %v138_v4, %v100_v6  ;;  %305 = vtanh.f32 %v159_v9 }
  0xd0   :  { %v141_v11 = vpop.xlane.xlu1 %140  ;;  %v214_v36 = vsel %vm213_vm1, %v188_v28, %v184_v31 }
  0xd1   :  { %v160_v10 = vadd.f32 %v154_v59, %v150_v8  ;;  %v302_v24 = vpop.eup %301 }
  0xd2   :  { %v103_v12 = vpop.xlane.xlu0 %102  ;;  %v192_v30 = vrot.slane %v302_v24, %v183_v25 }
  0xd3   :  { %v151_v13 = vadd.f32 %v141_v11, %v103_v12  ;;  %307 = vtanh.f32 %v160_v10 }
  0xd4   :  { %v144_v16 = vpop.xlane.xlu1 %143  ;;  %v216_v38 = vsel %vm215_vm2, %v192_v30, %v214_v36 }
  0xd5   :  { %v161_v15 = vadd.f32 %v154_v59, %v151_v13  ;;  %v304_v26 = vpop.eup %303 }
  0xd6   :  { %v106_v17 = vpop.xlane.xlu0 %105  ;;  %v196_v32 = vrot.slane %v304_v26, %v183_v25 }
  0xd7   :  { %309 = vtanh.f32 %v161_v15  ;;  %v152_v18 = vadd.f32 %v144_v16, %v106_v17 }
  0xd8   :  { %v218_v39 = vsel %vm217_vm3, %v196_v32, %v216_v38 }
  0xd9   :  { %v162_v21 = vadd.f32 %v154_v59, %v152_v18  ;;  %v306_v27 = vpop.eup %305 }
  0xda   :  { %v200_v34 = vrot.slane %v306_v27, %v183_v25 }
  0xdb   :  { %311 = vtanh.f32 %v162_v21 }
  0xdc   :  { %v220_v41 = vsel %vm219_vm4, %v200_v34, %v218_v39 }
  0xdd   :  { %v308_v29 = vpop.eup %307 }
  0xde   :  { %v204_v35 = vrot.slane %v308_v29, %v183_v25 }
  0xe0   :  { %v222_v43 = vsel %vm221_vm5, %v204_v35, %v220_v41 }
  0xe1   :  { %v310_v33 = vpop.eup %309 }
  0xe2   :  { %v208_v37 = vrot.slane %v310_v33, %v183_v25 }
  0xe4   :  { %v224_v44 = vsel %vm223_vm6, %v208_v37, %v222_v43 }
  0xe5   :  { %v312_v40 = vpop.eup %311 }
  0xe6   :  { %v212_v42 = vrot.slane %v312_v40, %v183_v25 }
  0xe8   :  { %v226_v45 = vsel %vm225_vm7, %v212_v42, %v224_v44 }
  0xe9   :  { %228 = vxpose.xlu0.b32.start.end [1/1] (short) (narrow) %v226_v45, 8 }
 0x169   :  { %v244_v46 = vpop.trf.xlu0 }
 0x16a   :  { %v261_v47 = vsel %vm260_vm8, %v244_v46, -inf }
 0x16b   :  { %262 = vmax.xlane.f32.xlu1 %v261_v47 }
 0x1f8   :  { %v263_v48 = vpop.xlane.xlu1 %262 }
 0x1f9   :  { %v264_v49 = vsub.f32 %v244_v46, %v263_v48 }
 0x1fb   :  { %v265_v50 = vmul.f32 1.442695, %v264_v49 }
 0x1fd   :  { %313 = vpow2.f32 %v265_v50 }
 0x207   :  { %v314_v51 = vpop.eup %313 }
 0x208   :  { %v267_v52 = vsel %vm260_vm8, %v314_v51, 0.0 }
 0x209   :  { %268 = vadd.xlane.f32.xlu1 %v267_v52 }
 0x296   :  { %v269_v53 = vpop.xlane.xlu1 %268 }
 0x297   :  { %315 = vrcp.f32 %v269_v53 }
 0x2a1   :  { %v316_v54 = vpop.eup %315 }
 0x2a2   :  { %v271_v55 = vmul.f32 %v316_v54, %v314_v51 }
 0x2a4   :  { %272 = vst.msk [vmem:[#allocation8] sm:$0x3] %vm260_vm8, %v271_v55 }
 0x2a5   :  { %372 = shalt.err (!%p369_p6)
}
 0x2a6   :  { %s373_s25 = scalar_lea.hbm %s493_s5, 32 }
 0x2a7   :  { %p374_p7 = scmp.ne.s32.totalorder %s493_s5, %s373_s25  ;;  %p377_p8 = scmp.lt.u32.totalorder %s373_s25, %s493_s5 }
 0x2a9   :  { %p379_p9 = pnand %p377_p8, %p374_p7 }
 0x2ab   :  { %382 = shalt.err (!%p379_p9)
}
 0x2ac   :  { %282 = dma.vmem_to_hbm [thread:$0]  %s280_s4, 32, %s493_s5, [#allocation5]  }
 0x2ad   :  { %387 = dma.done.wait [#allocation5], 32  }
 0x2ae   :  { %388 = vsyncadd [#allocation5], 4294967264 }
 0x2af   :  { %286 = vsyncpa [#allocation4], 1 }
 0x2b0   :  { %287 = vsyncpa [#allocation7], 1 }
 0x2b1   :  { %288 = vsyncpa [#allocation5], 1 }

</bundles_post_ra>
